<compile_context>
chip_gen: v6e
topology: v6e:2x2x1
jax: 0.10.0
libtpu: 0.0.40
codegen_flags: <defaults>
</compile_context>

<pallas_src>
import functools
import numpy as np
import jax
import jax.numpy as jnp
from jax import lax
from jax.experimental import pallas as pl
from jax.experimental.pallas import tpu as pltpu

# ----------------------- synthetic configuration -----------------------
TS_CFG = dict(patch_size=4, num_layers=2, hidden_size=32, num_features=2,
              max_length=16)             # config.ts
LM_CFG = dict(vocab=128, hidden=32, n_heads=4, n_kv_heads=2, head_dim=8,
              intermediate=64, n_layers=2, rope_theta=10000.0, rms_eps=1e-6)
TS_TOKEN_ID = 100                        # config.ts_token_start_index

_INV_SQRT2 = np.float32(1.0 / np.sqrt(2.0))
_PL_RECIP = getattr(pl, "reciprocal", None)


def _full_spec(shape):
    """Whole-array BlockSpec for a grid=(1,) call."""
    zeros = (0,) * len(shape)
    return pl.BlockSpec(shape, lambda i, _z=zeros: _z)


# ----------------------------- Pallas kernels -----------------------------
def _ts_mlp_kernel(x_ref, w1_ref, b1_ref, w2_ref, b2_ref, o_ref):
    # Linear -> exact GELU (torch nn.GELU default is erf form) -> Linear, fused.
    h = jnp.dot(x_ref[...], w1_ref[...],
                preferred_element_type=jnp.float32) + b1_ref[...]
    h = 0.5 * h * (1.0 + lax.erf(h * _INV_SQRT2))
    o = jnp.dot(h, w2_ref[...],
                preferred_element_type=jnp.float32) + b2_ref[...]
    o_ref[...] = o.astype(o_ref.dtype)


def pallas_ts_mlp(x, w1, b1, w2, b2):
    R, _ = x.shape
    H = w1.shape[1]
    N = w2.shape[1]
    args = (x, w1, b1.reshape(1, H), w2, b2.reshape(1, N))
    return pl.pallas_call(
        _ts_mlp_kernel,
        out_shape=jax.ShapeDtypeStruct((R, N), x.dtype),
        grid=(1,),
        in_specs=[_full_spec(a.shape) for a in args],
        out_specs=_full_spec((R, N)),
        compiler_params=pltpu.CompilerParams(
            dimension_semantics=("arbitrary",)),
    )(*args)


def _decoder_layer_kernel(h_ref, cosq_ref, sinq_ref, cosk_ref, sink_ref,
                          ln1_ref, wqkv_ref, bqkv_ref, wroll_ref, broll_ref,
                          wo_ref, ln2_ref, wgu_ref, wd_ref, *rest,
                          n_heads, n_kv_heads, head_dim, eps, final_norm):
    """One full Qwen2 decoder layer fused in a single kernel invocation.

    RMSNorm -> fused QKV (+rolled QK for RoPE) -> full-D GQA causal attention
    -> single o-projection + residual -> RMSNorm -> SwiGLU MLP + residual
    (-> final model RMSNorm when `final_norm`).
    """
    if final_norm:
        fin_ref, o_ref, attn_scratch = rest
    else:
        o_ref, attn_scratch = rest

    f32 = jnp.float32
    h = h_ref[...].astype(f32)                      # (T, hidden) residual stream
    T = h.shape[0]
    D = head_dim
    qd = n_heads * D
    kd = n_kv_heads * D

    def rms(x, w):
        var = jnp.mean(x * x, axis=-1, keepdims=True)
        return x * lax.rsqrt(var + eps) * w

    # --- attention block ---
    hn = rms(h, ln1_ref[...])

    # One lane-dense fused QKV matmul (Q columns pre-scaled by 1/sqrt(D)),
    # plus one lane-dense matmul for the rotate-half counterparts of Q and K.
    qkv = jnp.dot(hn, wqkv_ref[...], preferred_element_type=f32) + bqkv_ref[...]
    qk_roll = jnp.dot(hn, wroll_ref[...], preferred_element_type=f32) + broll_ref[...]

    q = qkv[:, :qd]
    k = qkv[:, qd:qd + kd]
    v = qkv[:, qd + kd:]
    q_roll = qk_roll[:, :qd]
    k_roll = qk_roll[:, qd:]

    # neox rotate-half RoPE on the full head_dim, purely elementwise:
    #   x_rot = x * [cos,cos]  +  [x2,x1] * [-sin,sin]
    q_rot = q * cosq_ref[...] + q_roll * sinq_ref[...]          # (T, nH*D)
    k_rot = k * cosk_ref[...] + k_roll * sink_ref[...]          # (T, nKV*D)

    row = lax.broadcasted_iota(jnp.int32, (T, T), 0)
    col = lax.broadcasted_iota(jnp.int32, (T, T), 1)
    causal = col <= row
    neg = f32(-1e30)

    # TODO(synk): at production head counts (nH=28-32) convert this static loop
    # to a fori_loop / extra grid axis and a flash-style KV-tile reduction.
    rep = n_heads // n_kv_heads
    for kv in range(n_kv_heads):
        k_h = k_rot[:, kv * D:(kv + 1) * D]                     # shared by `rep` q heads
        v_h = v[:, kv * D:(kv + 1) * D]
        for r in range(rep):
            qh = kv * rep + r
            q_h = q_rot[:, qh * D:(qh + 1) * D]
            s = lax.dot_general(q_h, k_h, (((1,), (1,)), ((), ())),
                                preferred_element_type=f32)     # full-D contraction
            s = jnp.where(causal, s, neg)
            m = jnp.max(s, axis=-1, keepdims=True)
            p = jnp.exp(s - m)
            l = jnp.sum(p, axis=-1, keepdims=True)
            o_h = jnp.dot(p, v_h, preferred_element_type=f32)   # (T, D)
            # normalize AFTER the PV matmul: O(T*D) multiplies, EUP reciprocal
            if _PL_RECIP is not None:
                o_h = o_h * _PL_RECIP(l, approx=True)
            else:
                o_h = o_h / l
            attn_scratch[:, qh * D:(qh + 1) * D] = o_h          # lane-dense accum buffer

    # Single o-projection (K = nH*D) fused with the residual add.
    h1 = h + jnp.dot(attn_scratch[...], wo_ref[...], preferred_element_type=f32)

    # --- MLP block (RMSNorm + fused gate/up SwiGLU + residual) ---
    hn2 = rms(h1, ln2_ref[...])
    gu = jnp.dot(hn2, wgu_ref[...], preferred_element_type=f32)
    inter = wgu_ref.shape[1] // 2
    g = gu[:, :inter]
    u = gu[:, inter:]
    act = g * jax.nn.sigmoid(g) * u
    out = h1 + jnp.dot(act, wd_ref[...], preferred_element_type=f32)

    if final_norm:
        out = rms(out, fin_ref[...])                            # fused final model norm

    o_ref[...] = out.astype(o_ref.dtype)


def pallas_decoder_layer(h, rope, kp, cfg, final_ln=None):
    T, hid = h.shape
    final_norm = final_ln is not None
    kernel = functools.partial(
        _decoder_layer_kernel,
        n_heads=cfg['n_heads'], n_kv_heads=cfg['n_kv_heads'],
        head_dim=cfg['head_dim'], eps=cfg['rms_eps'], final_norm=final_norm)
    args = [h, rope['cos_q'], rope['sin_q'], rope['cos_k'], rope['sin_k'],
            kp['ln1'], kp['wqkv'], kp['bqkv'], kp['wroll'], kp['broll'],
            kp['wo'], kp['ln2'], kp['wgu'], kp['wd']]
    if final_norm:
        args.append(final_ln.reshape(1, hid))
    return pl.pallas_call(
        kernel,
        out_shape=jax.ShapeDtypeStruct((T, hid), h.dtype),
        grid=(1,),
        in_specs=[_full_spec(a.shape) for a in args],
        out_specs=_full_spec((T, hid)),
        scratch_shapes=[
            pltpu.VMEM((T, cfg['n_heads'] * cfg['head_dim']), jnp.float32)],
        compiler_params=pltpu.CompilerParams(
            dimension_semantics=("arbitrary",),
            vmem_limit_bytes=32 * 1024 * 1024),
    )(*args)


# ------------------------- weight layout (hoisted) -------------------------
def prepare_layer_kernel_params(lp, cfg):
    """Precompute the kernel weight layout ONCE (at weight-load time):
    fused+scaled QKV, column-rolled QK copies for RoPE, fused gate/up."""
    nH, nKV, D = cfg['n_heads'], cfg['n_kv_heads'], cfg['head_dim']
    hid = cfg['hidden']
    half = D // 2
    qd, kd = nH * D, nKV * D
    scale = jnp.float32(1.0 / np.sqrt(D))

    wqkv, bqkv = lp['wqkv'], lp['bqkv']
    wq = wqkv[:, :qd] * scale                 # fold 1/sqrt(D) into Q projection
    wk = wqkv[:, qd:qd + kd]
    wv = wqkv[:, qd + kd:]
    bq = bqkv[:qd] * scale
    bk = bqkv[qd:qd + kd]
    bv = bqkv[qd + kd:]

    def roll_half(w, n):
        # swap the two rotary halves within each head's D output columns
        w3 = w.reshape(w.shape[:-1] + (n, D))
        w3 = jnp.concatenate([w3[..., half:], w3[..., :half]], axis=-1)
        return w3.reshape(w.shape)

    return dict(
        ln1=lp['ln1'].reshape(1, hid),
        ln2=lp['ln2'].reshape(1, hid),
        wqkv=jnp.concatenate([wq, wk, wv], axis=1),
        bqkv=jnp.concatenate([bq, bk, bv]).reshape(1, -1),
        wroll=jnp.concatenate([roll_half(wq, nH), roll_half(wk, nKV)], axis=1),
        broll=jnp.concatenate([roll_half(bq, nH), roll_half(bk, nKV)]).reshape(1, -1),
        wo=lp['wo'],
        wgu=jnp.concatenate([lp['wg'], lp['wu']], axis=1),
        wd=lp['wd'])


def prepare_kernel_layers(params, cfg):
    return [prepare_layer_kernel_params(lp, cfg) for lp in params['layers']]


def make_rope_tables(positions, cfg):
    """Pre-tiled (T, nH*D)/(T, nKV*D) cos and sign-folded sin tables, shared by
    all layers (computed once per forward)."""
    D = cfg['head_dim']
    half = D // 2
    f32 = jnp.float32
    inv_freq = 1.0 / (cfg['rope_theta'] ** (jnp.arange(half, dtype=f32) / half))
    freqs = positions.astype(f32)[:, None] * inv_freq[None, :]
    cos, sin = jnp.cos(freqs), jnp.sin(freqs)
    cos_full = jnp.concatenate([cos, cos], axis=-1)          # (T, D)
    sin_signed = jnp.concatenate([-sin, sin], axis=-1)       # (T, D)
    return dict(
        cos_q=jnp.tile(cos_full, (1, cfg['n_heads'])),
        sin_q=jnp.tile(sin_signed, (1, cfg['n_heads'])),
        cos_k=jnp.tile(cos_full, (1, cfg['n_kv_heads'])),
        sin_k=jnp.tile(sin_signed, (1, cfg['n_kv_heads'])))


# ------------------------------ glue (JAX) ------------------------------
def ts_encoder_forward(ts, patch_cnt_np, params):
    """TimeSeriesEmbedding.forward (default config: no position emb/idx)."""
    B, L, _ = ts.shape
    ps = TS_CFG['patch_size']
    # value * mask == contiguous-valid prefix followed by zero padding,
    # identical to the torch per-sample zero padding of xi.
    values = ts[:, :, 0] * ts[:, :, 1]
    max_patches = L // ps
    patches = values.reshape(B * max_patches, ps)
    feats = pallas_ts_mlp(patches, params['ts_w1'], params['ts_b1'],
                          params['ts_w2'], params['ts_b2'])
    # Ragged concat of only the valid patches per sample (host glue; mirrors the
    # .item() python loop in the torch module).
    # TODO(synk): at production sizes move this gather into the kernel via
    # PrefetchScalarGridSpec scalar-prefetched row indices.
    gather_idx = np.concatenate(
        [np.arange(int(pc)) + i * max_patches
         for i, pc in enumerate(patch_cnt_np)] or [np.zeros((0,), np.int32)]
    ).astype(np.int32)
    return feats[jnp.asarray(gather_idx)]


def model_forward(input_ids, positions, ts, patch_cnt_np, params, kernel_layers):
    cfg = LM_CFG
    # get_multimodal_embeddings -> ts_encoder + per-sample split (kept flat)
    ts_features = ts_encoder_forward(ts, patch_cnt_np, params)
    # get_input_embeddings: embedding lookup + merge_multimodal_embeddings
    embeds = params['embed_tokens'][input_ids]
    is_ts = (input_ids == TS_TOKEN_ID)
    idx = jnp.clip(jnp.cumsum(is_ts.astype(jnp.int32)) - 1, 0,
                   ts_features.shape[0] - 1)
    h = jnp.where(is_ts[:, None], ts_features[idx], embeds)

    # RoPE tables shared by all layers, computed once.
    rope = make_rope_tables(positions, cfg)

    # language_model.model(...) -> one fused Pallas kernel per decoder layer;
    # the final model RMSNorm is fused into the last layer's kernel.
    n_layers = len(kernel_layers)
    for li, kp in enumerate(kernel_layers):
        final_ln = params['final_ln'] if li == n_layers - 1 else None
        h = pallas_decoder_layer(h, rope, kp, cfg, final_ln=final_ln)
    return h


# --------------------------- pure-JAX reference ---------------------------
def _ref_rmsnorm(x, w, eps):
    var = jnp.mean(x * x, axis=-1, keepdims=True)
    return x * lax.rsqrt(var + eps) * w


def apply_rope(x, positions, theta):
    # x: (T, n_heads, D), neox-style rotate-half RoPE
    T, n, D = x.shape
    half = D // 2
    inv_freq = 1.0 / (theta ** (jnp.arange(half, dtype=jnp.float32) / half))
    freqs = positions.astype(jnp.float32)[:, None] * inv_freq[None, :]
    cos = jnp.cos(freqs)[:, None, :]
    sin = jnp.sin(freqs)[:, None, :]
    x1, x2 = x[..., :half], x[..., half:]
    return jnp.concatenate([x1 * cos - x2 * sin, x2 * cos + x1 * sin], axis=-1)


def _ref_attention(q, k, v, scale):
    s = jnp.einsum('htd,hsd->hts', q, k) * scale
    T = q.shape[1]
    mask = jnp.tril(jnp.ones((T, T), bool))
    s = jnp.where(mask[None], s, -1e30)
    m = jnp.max(s, -1, keepdims=True)
    p = jnp.exp(s - m)
    p = p / jnp.sum(p, -1, keepdims=True)
    return jnp.einsum('hts,hsd->htd', p, v)


def ref_forward(input_ids, positions, ts, patch_cnt_np, params):
    cfg = LM_CFG
    ps = TS_CFG['patch_size']
    B, L, _ = ts.shape
    values = ts[:, :, 0] * ts[:, :, 1]
    patches = values.reshape(B * (L // ps), ps)
    h1 = patches @ params['ts_w1'] + params['ts_b1']
    h1 = 0.5 * h1 * (1.0 + lax.erf(h1 * _INV_SQRT2))
    feats = h1 @ params['ts_w2'] + params['ts_b2']
    gather_idx = np.concatenate(
        [np.arange(int(pc)) + i * (L // ps)
         for i, pc in enumerate(patch_cnt_np)]).astype(np.int32)
    ts_features = feats[jnp.asarray(gather_idx)]

    embeds = params['embed_tokens'][input_ids]
    is_ts = (input_ids == TS_TOKEN_ID)
    idx = jnp.clip(jnp.cumsum(is_ts.astype(jnp.int32)) - 1, 0,
                   ts_features.shape[0] - 1)
    h = jnp.where(is_ts[:, None], ts_features[idx], embeds)

    nH, nKV, D = cfg['n_heads'], cfg['n_kv_heads'], cfg['head_dim']
    T = h.shape[0]
    for lp in params['layers']:
        residual = h
        hn = _ref_rmsnorm(h, lp['ln1'], cfg['rms_eps'])
        qkv = hn @ lp['wqkv'] + lp['bqkv']
        qd, kd = nH * D, nKV * D
        q = apply_rope(qkv[:, :qd].reshape(T, nH, D), positions, cfg['rope_theta'])
        k = apply_rope(qkv[:, qd:qd + kd].reshape(T, nKV, D), positions,
                       cfg['rope_theta'])
        v = qkv[:, qd + kd:].reshape(T, nKV, D)
        rep = nH // nKV
        k = jnp.repeat(k, rep, axis=1)
        v = jnp.repeat(v, rep, axis=1)
        q, k, v = (jnp.transpose(a, (1, 0, 2)) for a in (q, k, v))
        attn = _ref_attention(q, k, v, 1.0 / np.sqrt(D))
        attn = jnp.transpose(attn, (1, 0, 2)).reshape(T, nH * D)
        h = residual + attn @ lp['wo']
        residual = h
        hn = _ref_rmsnorm(h, lp['ln2'], cfg['rms_eps'])
        g = hn @ lp['wg']
        u = hn @ lp['wu']
        h = residual + ((g * jax.nn.sigmoid(g)) * u) @ lp['wd']
    return _ref_rmsnorm(h, params['final_ln'], cfg['rms_eps'])


# ------------------------------- params -------------------------------
def init_params(key):
    cfg, tcfg = LM_CFG, TS_CFG
    keys = iter(jax.random.split(key, 64))

    def nrm(shape, scale):
        return scale * jax.random.normal(next(keys), shape, dtype=jnp.float32)

    p = {
        'ts_w1': nrm((tcfg['patch_size'], tcfg['hidden_size']), 0.1),
        'ts_b1': nrm((tcfg['hidden_size'],), 0.1),
        'ts_w2': nrm((tcfg['hidden_size'], tcfg['hidden_size']), 0.1),
        'ts_b2': nrm((tcfg['hidden_size'],), 0.1),
        'embed_tokens': nrm((cfg['vocab'], cfg['hidden']), 0.02),
        'final_ln': jnp.ones((cfg['hidden'],), jnp.float32),
    }
    qkv_out = (cfg['n_heads'] + 2 * cfg['n_kv_heads']) * cfg['head_dim']
    layers = []
    for _ in range(cfg['n_layers']):
        layers.append(dict(
            ln1=jnp.ones((cfg['hidden'],), jnp.float32),
            wqkv=nrm((cfg['hidden'], qkv_out), 0.05),
            bqkv=nrm((qkv_out,), 0.05),
            wo=nrm((cfg['n_heads'] * cfg['head_dim'], cfg['hidden']), 0.05),
            ln2=jnp.ones((cfg['hidden'],), jnp.float32),
            wg=nrm((cfg['hidden'], cfg['intermediate']), 0.05),
            wu=nrm((cfg['hidden'], cfg['intermediate']), 0.05),
            wd=nrm((cfg['intermediate'], cfg['hidden']), 0.05),
        ))
    p['layers'] = layers
    return p


# -------------------------------- main --------------------------------
if __name__ == "__main__":
    key = jax.random.PRNGKey(0)
    kp, kd = jax.random.split(key)
    params = init_params(kp)

    # Kernel weight layout precomputed ONCE (hoisted out of the forward path).
    # TODO(synk): at production sizes also cast these to bf16 for the v6e/v7x
    # MXU (keep RMSNorm / softmax math in f32 inside the kernel).
    kernel_layers = prepare_kernel_layers(params, LM_CFG)
    kernel_layers = jax.block_until_ready(kernel_layers)

    # Two synthetic time series (valid lengths 10 and 7), zero-padded to
    # max_length=16, feature 1 is the validity mask (as produced by the HF
    # processor / _parse_and_validate_ts_input concatenation).
    B_ts, L = 2, TS_CFG['max_length']
    vals = jax.random.normal(kd, (B_ts, L), dtype=jnp.float32)
    valid_lengths = np.array([10, 7], dtype=np.int64)
    mask_np = (np.arange(L)[None, :] < valid_lengths[:, None]).astype(np.float32)
    ts = jnp.stack([vals, jnp.asarray(mask_np)], axis=-1)   # (2, 16, 2)

    # mask.sum / patch_cnt bookkeeping (host glue, mirrors the torch loop)
    ps = TS_CFG['patch_size']
    patch_cnt = (valid_lengths + ps - 1) // ps              # [3, 2] -> 5 patches

    # flat token stream with exactly sum(patch_cnt)=5 <ts> placeholder tokens
    T = 16
    input_ids = jnp.asarray(np.array(
        [3, TS_TOKEN_ID, TS_TOKEN_ID, TS_TOKEN_ID, 7, 25,
         TS_TOKEN_ID, TS_TOKEN_ID, 42, 11, 63, 5, 99, 17, 88, 1],
        dtype=np.int32))
    positions = jnp.arange(T, dtype=jnp.int32)

    out = model_forward(input_ids, positions, ts, patch_cnt, params, kernel_layers)
    out = jax.block_until_ready(out)
    assert out.shape == (T, LM_CFG['hidden'])

    ref = jax.block_until_ready(
        ref_forward(input_ids, positions, ts, patch_cnt, params))
    np.testing.assert_allclose(np.asarray(out), np.asarray(ref),
                               rtol=1e-2, atol=1e-2)
    # TODO(synk): compute_logits / lm_head and vLLM weight loading & multimodal
    # processor plumbing are not part of the numeric forward pass and are omitted.
    print("KERNEL_OK")
</pallas_src>

<mosaic_0001>
module attributes {stable_mosaic.version = 11 : i64} {
  func.func @_ts_mlp_kernel(%arg0: i32, %arg1: memref<8x4xf32, #tpu.memory_space<vmem>>, %arg2: memref<4x32xf32, #tpu.memory_space<vmem>>, %arg3: memref<1x32xf32, #tpu.memory_space<vmem>>, %arg4: memref<32x32xf32, #tpu.memory_space<vmem>>, %arg5: memref<1x32xf32, #tpu.memory_space<vmem>>, %arg6: memref<8x32xf32, #tpu.memory_space<vmem>>) attributes {dimension_semantics = [#tpu.dimension_semantics<arbitrary>], iteration_bounds = array<i64: 1>, scalar_prefetch = 0 : i64, scratch_operands = 0 : i64, tpu.core_type = #tpu.core_type<tc>, window_params = [{pipeline_mode = #tpu.pipeline_mode<synchronous>, transform_indices = @transform_0, window_bounds = array<i64: 8, 4>}, {pipeline_mode = #tpu.pipeline_mode<synchronous>, transform_indices = @transform_1, window_bounds = array<i64: 4, 32>}, {pipeline_mode = #tpu.pipeline_mode<synchronous>, transform_indices = @transform_2, window_bounds = array<i64: 1, 32>}, {pipeline_mode = #tpu.pipeline_mode<synchronous>, transform_indices = @transform_3, window_bounds = array<i64: 32, 32>}, {pipeline_mode = #tpu.pipeline_mode<synchronous>, transform_indices = @transform_4, window_bounds = array<i64: 1, 32>}, {pipeline_mode = #tpu.pipeline_mode<synchronous>, transform_indices = @transform_5, window_bounds = array<i64: 8, 32>}]} {
    %c0 = arith.constant 0 : index
    %c0_0 = arith.constant 0 : index
    %0 = vector.load %arg1[%c0, %c0_0] : memref<8x4xf32, #tpu.memory_space<vmem>>, vector<8x4xf32>
    %c0_1 = arith.constant 0 : index
    %c0_2 = arith.constant 0 : index
    %1 = vector.load %arg2[%c0_1, %c0_2] : memref<4x32xf32, #tpu.memory_space<vmem>>, vector<4x32xf32>
    %cst = arith.constant dense<0.000000e+00> : vector<8x32xf32>
    %2 = tpu.matmul %0, %1, %cst {dimension_numbers = #tpu.dot_dimension_numbers<[1], [0], [0], [1], [0, 0, 1, 1], [], []>} : vector<8x4xf32>, vector<4x32xf32>, vector<8x32xf32> -> vector<8x32xf32>
    %c0_3 = arith.constant 0 : index
    %c0_4 = arith.constant 0 : index
    %3 = vector.load %arg3[%c0_3, %c0_4] : memref<1x32xf32, #tpu.memory_space<vmem>>, vector<1x32xf32>
    %4 = vector.broadcast %3 : vector<1x32xf32> to vector<8x32xf32>
    %5 = arith.addf %2, %4 : vector<8x32xf32>
    %cst_5 = arith.constant 5.000000e-01 : f32
    %6 = vector.broadcast %cst_5 : f32 to vector<8x32xf32>
    %7 = arith.mulf %6, %5 : vector<8x32xf32>
    %cst_6 = arith.constant 0.707106769 : f32
    %8 = vector.broadcast %cst_6 : f32 to vector<8x32xf32>
    %9 = arith.mulf %5, %8 : vector<8x32xf32>
    %10 = math.erf %9 : vector<8x32xf32>
    %cst_7 = arith.constant 1.000000e+00 : f32
    %11 = vector.broadcast %cst_7 : f32 to vector<8x32xf32>
    %12 = arith.addf %11, %10 : vector<8x32xf32>
    %13 = arith.mulf %7, %12 : vector<8x32xf32>
    %c0_8 = arith.constant 0 : index
    %c0_9 = arith.constant 0 : index
    %14 = vector.load %arg4[%c0_8, %c0_9] : memref<32x32xf32, #tpu.memory_space<vmem>>, vector<32x32xf32>
    %cst_10 = arith.constant dense<0.000000e+00> : vector<8x32xf32>
    %15 = tpu.matmul %13, %14, %cst_10 {dimension_numbers = #tpu.dot_dimension_numbers<[1], [0], [0], [1], [0, 0, 1, 1], [], []>} : vector<8x32xf32>, vector<32x32xf32>, vector<8x32xf32> -> vector<8x32xf32>
    %c0_11 = arith.constant 0 : index
    %c0_12 = arith.constant 0 : index
    %16 = vector.load %arg5[%c0_11, %c0_12] : memref<1x32xf32, #tpu.memory_space<vmem>>, vector<1x32xf32>
    %17 = vector.broadcast %16 : vector<1x32xf32> to vector<8x32xf32>
    %18 = arith.addf %15, %17 : vector<8x32xf32>
    %c0_13 = arith.constant 0 : index
    %c0_14 = arith.constant 0 : index
    %19 = vector.load %arg6[%c0_13, %c0_14] : memref<8x32xf32, #tpu.memory_space<vmem>>, vector<8x32xf32>
    tpu.vector_store %arg6[%c0_13, %c0_14], %18 {strides = array<i32>} : memref<8x32xf32, #tpu.memory_space<vmem>>, vector<8x32xf32>,
    return
  }
  func.func @transform_0(%arg0: i32) -> (i32, i32) {
    %c0_i32 = arith.constant 0 : i32
    %c0_i32_0 = arith.constant 0 : i32
    %c0_i32_1 = arith.constant 0 : i32
    return %c0_i32, %c0_i32_0 : i32, i32
  }
  func.func @transform_1(%arg0: i32) -> (i32, i32) {
    %c0_i32 = arith.constant 0 : i32
    %c0_i32_0 = arith.constant 0 : i32
    %c0_i32_1 = arith.constant 0 : i32
    return %c0_i32, %c0_i32_0 : i32, i32
  }
  func.func @transform_2(%arg0: i32) -> (i32, i32) {
    %c0_i32 = arith.constant 0 : i32
    %c0_i32_0 = arith.constant 0 : i32
    %c0_i32_1 = arith.constant 0 : i32
    return %c0_i32, %c0_i32_0 : i32, i32
  }
  func.func @transform_3(%arg0: i32) -> (i32, i32) {
    %c0_i32 = arith.constant 0 : i32
    %c0_i32_0 = arith.constant 0 : i32
    %c0_i32_1 = arith.constant 0 : i32
    return %c0_i32, %c0_i32_0 : i32, i32
  }
  func.func @transform_4(%arg0: i32) -> (i32, i32) {
    %c0_i32 = arith.constant 0 : i32
    %c0_i32_0 = arith.constant 0 : i32
    %c0_i32_1 = arith.constant 0 : i32
    return %c0_i32, %c0_i32_0 : i32, i32
  }
  func.func @transform_5(%arg0: i32) -> (i32, i32) {
    %c0_i32 = arith.constant 0 : i32
    %c0_i32_0 = arith.constant 0 : i32
    %c0_i32_1 = arith.constant 0 : i32
    return %c0_i32, %c0_i32_0 : i32, i32
  }
}

</mosaic_0001>

<bundles_post_ra>
// kernel: tpu_custom_call.1
= control target key start
LH: loop header
LB: loop body
LE: loop exit
PB: predicated region body
PF: predicated region fallthrough
CT: control target
= control target key end

     0   :  { %10 = vsyncpa [#allocation3], 0  ;;  %s362_s0 = inlined_call_operand.vmem [shape: f32[8,4], index: 0, kind: input, shape index: {}]   ;;  %s363_s1 = inlined_call_operand.vmem [shape: f32[4,32], index: 1, kind: input, shape index: {}]   ;;  %s364_s2 = inlined_call_operand.vmem [shape: f32[1,32], index: 2, kind: input, shape index: {}]   ;;  %s365_s3 = inlined_call_operand.hbm [shape: f32[32,32], index: 3, kind: input, shape index: {}]   ;;  %s366_s4 = inlined_call_operand.vmem [shape: f32[1,32], index: 4, kind: input, shape index: {}]   ;;  %s367_s5 = inlined_call_operand.hbm [shape: f32[8,32], index: 5, kind: output, shape index: {}]  }
   0x1   :  { %11 = vsyncpa [#allocation4], 0  ;;  %s308_s18 = smov [#allocation2]  }
   0x2   :  { %s23_s19 = sshll.u32 %s308_s18, 4  ;;  %s24_s19 = int_to_ptr.vmem [resolvable:$true] %s23_s19 }
   0x3   :  { %s272_s20 = scalar_lea.vmem %s24_s19, 512  ;;  %p277_p1 = scmp.lt.s32.totalorder %s24_s19, %s24_s19 }
   0x4   :  { %p273_p0 = scmp.ne.s32.totalorder %s24_s19, %s272_s20  ;;  %p278_p2 = scmp.lt.s32.totalorder %s272_s20, %s272_s20 }
   0x6   :  { %p279_p3 = por %p278_p2, %p277_p1 }
   0x8   :  { %p280_p4 = pnand %p279_p3, %p273_p0 }
   0xa   :  { %283 = shalt.err (!%p280_p4)
}
   0xb   :  { %s309_s21 = smov 128   ;;  %s310_s22 = smov 8  }
   0xc   :  { %29 = dma.hbm_to_vmem [thread:$0]  %s365_s3, 512, %s24_s19, [#allocation3], %s309_s21, %s309_s21, %s310_s22  }
   0xd   :  { %304 = dma.done.wait [#allocation3], 512  }
   0xe   :  { %305 = vsyncadd [#allocation3], 4294966784  ;;  %v311_v0 = vmov 0.0   ;;  %vm312_vm0 = vmmov 0   ;;  %vm48_vm1 = vcmask 1043456   ;;  %vm44_vm2 = vcmask 31744  }
   0xf   :  { %240 = vmatprep.subr.mxu0 %v311_v0  ;;  %242 = vmatprep.mubr.msk.f32.mxu0 %vm312_vm0, %v311_v0  ;;  %v36_v1 = vld [vmem:[%s363_s1] sm:$0xf]  ;;  %v130_v3 = vld [vmem:[#allocation2 + $0x18] sm:$0xff]  ;;  %v129_v4 = vld [vmem:[#allocation2 + $0x10] sm:$0xff]  ;;  %vm138_vm3 = vcmask 261120   ;;  %s313_s30 = smov [#allocation5]  }
  0x10   :  { %245 = vmatprep.subr.mxu1 %v311_v0  ;;  %253 = vmatprep.mubr.msk.f32.mxu1 %vm312_vm0, %v311_v0  ;;  %v35_v2 = vld [vmem:[%s362_s0] sm:$0xff]  ;;  %v128_v5 = vld [vmem:[#allocation2 + $0x8] sm:$0xff]  ;;  %s219_s6 = sshll.u32 %s313_s30, 4  ;;  %s220_s6 = int_to_ptr.vmem [resolvable:$true] %s219_s6 }
  0x11   :  { %241 = vmatpush3.msk.msra.mxu0 %vm48_vm1, %v36_v1  ;;  %246 = vmatpush3.msra.mxu1 %v130_v3  ;;  %v127_v6 = vld [vmem:[#allocation2] sm:$0xff]  ;;  %p289_p6 = scmp.lt.s32.totalorder %s220_s6, %s220_s6 }
  0x12   :  { %243 = vmatmul.mubr.msk.f32.vlgmr.msra.gmra.mxu0 %vm44_vm2, %v35_v2  ;;  %247 = vmatprep.subr.mxu1 %v311_v0  ;;  %v228_v7 = vld [vmem:[%s364_s2] ss:$0 sm:$0xff]  ;;  %s284_s2 = scalar_lea.vmem %s220_s6, 128 }
  0x13   :  { %248 = vmatpush3.msra.mxu1 %v129_v4  ;;  %v231_v16 = vld [vmem:[%s366_s4] ss:$0 sm:$0xff]  ;;  %p285_p5 = scmp.ne.s32.totalorder %s220_s6, %s284_s2  ;;  %p290_p7 = scmp.lt.s32.totalorder %s284_s2, %s284_s2 }
  0x14   :  { %249 = vmatprep.subr.mxu1 %v311_v0 }
  0x15   :  { %250 = vmatpush3.msra.mxu1 %v128_v5  ;;  %p291_p8 = por %p290_p7, %p289_p6 }
  0x16   :  { %251 = vmatprep.subr.mxu1 %v311_v0 }
  0x17   :  { %252 = vmatpush3.msra.mxu1 %v127_v6  ;;  %p292_p9 = pnand %p291_p8, %p285_p5 }
  0xd2   :  { %v118_v8 = vpop.f32.mrf.mxu0 }
  0xd3   :  { %v119_v9 = vadd.f32 %v228_v7, %v118_v8 }
  0xd4   :  { %v244_v10 = vpop.f32.mrf.mxu0 }
  0xd5   :  { %v123_v11 = vmul.f32 0.70710677, %v119_v9  ;;  %v122_v13 = vmul.f32 0.5, %v119_v9 }
  0xd7   :  { %262 = verf.f32 %v123_v11 }
  0xe4   :  { %v263_v12 = vpop.eup %262 }
  0xe5   :  { %v125_v14 = vadd.f32 1.0, %v263_v12 }
  0xe7   :  { %v126_v15 = vmul.f32 %v125_v14, %v122_v13 }
  0xe9   :  { %254 = vmatmul.mubr.msk.f32.vlgmr.msra.gmra.mxu1 %vm138_vm3, %v126_v15 }
 0x1a9   :  { %v208_v17 = vpop.f32.mrf.mxu1 }
 0x1aa   :  { %v209_v18 = vadd.f32 %v231_v16, %v208_v17 }
 0x1ab   :  { %v255_v19 = vpop.f32.mrf.mxu1 }
 0x1ac   :  { %212 = vst.msk [vmem:[#allocation5] sm:$0xff] %vm138_vm3, %v209_v18 }
 0x1ad   :  { %295 = shalt.err (!%p292_p9)
}
 0x1ae   :  { %222 = dma.vmem_to_hbm [thread:$0]  %s220_s6, 128, %s367_s5, [#allocation4]  }
 0x1af   :  { %306 = dma.done.wait [#allocation4], 128  }
 0x1b0   :  { %307 = vsyncadd [#allocation4], 4294967168 }
 0x1b1   :  { %226 = vsyncpa [#allocation3], 1 }
 0x1b2   :  { %227 = vsyncpa [#allocation4], 1 }

</bundles_post_ra>
